<compile_context>
chip_gen: v7x
topology: tpu7x:2x2x1
jax: 0.10.0
libtpu: 0.0.40
codegen_flags: <defaults>
</compile_context>

<pallas_src>
import jax
import jax.numpy as jnp
from jax import lax
from jax.experimental import pallas as pl
from jax.experimental.pallas import tpu as pltpu

# ---- small deterministic config (consistent with the module's __init__) ----
B = 8                      # batch
INPUT_SHAPE = (1, 8, 8)    # (C, H, W)
I = INPUT_SHAPE[0] * INPUT_SHAPE[1] * INPUT_SHAPE[2]   # input_dim = 64
D = 32                     # deterministic_dim
S = 16                     # stochastic_dim
BN_EPS = 1e-5
DATA_COLS = 2 * I + S      # per-row data slab: [x_probs | uniforms_x | uniforms_latent]

# weight-slab row offsets (all multiples of 16 -> clean bf16 sublane packing)
R_W1 = 0                   # encoder Linear1          (I, *) rows 0..63
R_W2 = R_W1 + I            # encoder Linear2          (D, *) rows 64..95
R_WLAT = R_W2 + D          # fused [prior | layer1]   (S, *) rows 96..111
R_L2F = R_WLAT + S         # layer2 feature part      (D, *) rows 112..143
R_L2X = R_L2F + D          # layer2 shifted x part    (I, *) rows 144..207
W_ROWS = R_L2X + I         # 208


def _bce_with_logits(logits, targets):
    # BCEWithLogitsLoss(reduction='none'): max(l,0) - l*t + log1p(exp(-|l|))
    return (jnp.maximum(logits, 0.0) - logits * targets
            + jnp.log1p(jnp.exp(-jnp.abs(logits))))


def darn_kernel(data_ref, w_ref, b_ref, out_ref):
    Bk = data_ref.shape[1]

    data = data_ref[0]                       # (B, 2I+S) f32
    xp = data[:, :I]                         # input probabilities
    ux = data[:, I:2 * I]                    # uniforms for x_bin
    ul = data[:, 2 * I:2 * I + S]            # uniforms for latent

    # --- parameters: row-sliced bf16 weight slab, f32 bias slab ------------
    w1 = w_ref[R_W1:R_W1 + I, :]             # (I,128) cols [0,D) live
    w2 = w_ref[R_W2:R_W2 + D, :]             # (D,128) cols [0,S) live
    wlat = w_ref[R_WLAT:R_WLAT + S, :]       # (S,128) cols [0,S)=prior, [S,S+D)=layer1
    l2wf = w_ref[R_L2F:R_L2F + D, :]         # (D,128) cols [0,I) live
    l2wx = w_ref[R_L2X:R_L2X + I, :]         # (I,128) cols [0,I) live
    bsl = b_ref[...]                         # (8,128) f32
    gamma = bsl[0:1, :D]
    beta = bsl[1:2, :D]
    b2 = bsl[2:3, :S]
    d1b = bsl[3:4, :D]
    pb = bsl[4:5, :S]
    l2b = bsl[5:6, :I]

    # --- x_bin ~ Bernoulli(probs = x) ---------------------------------------
    x_bin = jnp.where(ux < xp, 1.0, 0.0)                 # (B, I) f32 (targets)
    x_bin_bf = x_bin.astype(jnp.bfloat16)                # exact (0/1)

    # --- encoder: Linear -> BatchNorm1d(train) -> ReLU -> Linear ------------
    # (Linear bias before training-mode BN cancels exactly -> omitted.)
    h = jnp.dot(x_bin_bf, w1, preferred_element_type=jnp.float32)[:, :D]
    mu = jnp.mean(h, axis=0, keepdims=True)
    hc = h - mu
    var = jnp.mean(hc * hc, axis=0, keepdims=True)       # biased (training mode)
    h = hc * lax.rsqrt(var + BN_EPS) * gamma + beta
    h = jnp.maximum(h, 0.0)
    latent_logits = (jnp.dot(h.astype(jnp.bfloat16), w2,
                             preferred_element_type=jnp.float32)[:, :S] + b2)

    # --- latent ~ Bernoulli(logits = latent_logits) -------------------------
    latent = jnp.where(ul < jax.nn.sigmoid(latent_logits), 1.0, 0.0)   # (B, S)
    latent_bf = latent.astype(jnp.bfloat16)

    # --- fused latent-LHS dot: prior logits + decoder.layer1 pre-activation -
    lat_out = jnp.dot(latent_bf, wlat, preferred_element_type=jnp.float32)
    prior_logits = lat_out[:, :S] + pb                   # (B, S)
    feature = jnp.maximum(lat_out[:, S:S + D] + d1b, 0.0)  # (B, D)

    # --- decoder.layer2 (masked grouped conv as matmul): two dots, no concat
    logits2 = (jnp.dot(feature.astype(jnp.bfloat16), l2wf,
                       preferred_element_type=jnp.float32)
               + jnp.dot(x_bin_bf, l2wx,
                         preferred_element_type=jnp.float32))[:, :I] + l2b

    # --- BCE terms, one-shot scalar reduction --------------------------------
    #   mean_b(log_posterior - log_prior - log_sampling)
    #     = sum(bce_prior - bce_post)/(B*S) + sum(bce_dec)/(B*I)
    bce_post = _bce_with_logits(latent_logits, latent)
    bce_prior = _bce_with_logits(prior_logits, latent)
    bce_dec = _bce_with_logits(logits2, x_bin)
    loss = (jnp.sum(bce_prior - bce_post) * (1.0 / (Bk * S))
            + jnp.sum(bce_dec) * (1.0 / (Bk * I)))
    out_ref[0, 0] = loss


def init_params(key):
    """Deterministic synthetic parameters matching the PyTorch module shapes,
    pre-packed (pure parameter plumbing) into two slabs:
      wslab (208,128) bf16: all matmul weights, lane-padded to 128
      bslab (8,128)   f32 : BatchNorm affine + biases, one row each
    The masked grouped Conv1d autoregressive layers are rewritten as matmul
    weights (masked + shifted), same math as the reference module."""
    ks = jax.random.split(key, 9)
    w1 = jax.random.normal(ks[0], (I, D), jnp.float32) * 0.1    # encoder Linear1
    gamma = jnp.ones((D,), jnp.float32)                         # BatchNorm1d affine
    beta = jnp.zeros((D,), jnp.float32)
    w2 = jax.random.normal(ks[1], (D, S), jnp.float32) * 0.1    # encoder Linear2
    b2 = jax.random.normal(ks[2], (S,), jnp.float32) * 0.1
    d1w = jax.random.normal(ks[3], (S, D), jnp.float32) * 0.1   # decoder.layer1 Linear
    d1b = jax.random.normal(ks[4], (D,), jnp.float32) * 0.1

    # prior = DecoderLayer(0, S): Conv1d(S,S,S,groups=S) weight (S,1,S), mask=tril(S,S)
    wp = jax.random.normal(ks[5], (S, S), jnp.float32) * 0.1
    wp_m = wp * jnp.tril(jnp.ones((S, S), jnp.float32))
    # logits[b,i] = sum_k wp_m[i,k] * [0, latent[:, :-1]][b,k] + pb[i] == latent @ pw + pb
    pw = jnp.zeros((S, S), jnp.float32).at[:S - 1, :].set(wp_m[:, 1:].T)
    pb = jax.random.normal(ks[6], (S,), jnp.float32) * 0.1

    # decoder.layer2 = DecoderLayer(D, I, autoregress=True):
    #   Conv1d(I,I,D+I-1,groups=I) weight (I,1,D+I-1), mask=tril(..., diag=D-1)
    wl2 = jax.random.normal(ks[7], (I, D + I - 1), jnp.float32) * 0.1
    rows = jnp.arange(I)[:, None]
    cols = jnp.arange(D + I - 1)[None, :]
    wl2_m = wl2 * (cols <= rows + D - 1).astype(jnp.float32)
    l2wf = wl2_m[:, :D].T                                       # feature part (D, I)
    l2wx = jnp.zeros((I, I), jnp.float32).at[:I - 1, :].set(wl2_m[:, D:].T)  # shifted x part
    l2b = jax.random.normal(ks[8], (I,), jnp.float32) * 0.1

    # ---- pack into the two slabs -------------------------------------------
    def lane_pad(w):
        return jnp.pad(w, ((0, 0), (0, 128 - w.shape[1])))

    wlat = jnp.concatenate([pw, d1w], axis=1)                   # (S, S+D) fused latent-LHS weight
    wslab = jnp.concatenate(
        [lane_pad(w1), lane_pad(w2), lane_pad(wlat), lane_pad(l2wf), lane_pad(l2wx)],
        axis=0).astype(jnp.bfloat16)                            # (208, 128)

    bslab = jnp.zeros((8, 128), jnp.float32)
    bslab = bslab.at[0, :D].set(gamma)
    bslab = bslab.at[1, :D].set(beta)
    bslab = bslab.at[2, :S].set(b2)
    bslab = bslab.at[3, :D].set(d1b)
    bslab = bslab.at[4, :S].set(pb)
    bslab = bslab.at[5, :I].set(l2b)
    return wslab, bslab


def _darn_pallas(data, wslab, bslab):
    """data: (N, B, 2I+S) f32.  Returns (N,) losses, one per independent forward."""
    n, bb = data.shape[0], data.shape[1]
    flops = 2 * n * bb * (I * D + D * S + S * (S + D) + D * I + I * I)
    transcendentals = n * bb * (5 * S + 2 * I)
    bytes_accessed = int(data.size) * 4 + int(wslab.size) * 2 + int(bslab.size) * 4 + n * 4
    cost = pl.CostEstimate(flops=flops, transcendentals=transcendentals,
                           bytes_accessed=bytes_accessed)

    out = pl.pallas_call(
        darn_kernel,
        out_shape=jax.ShapeDtypeStruct((n, 1), jnp.float32),
        grid=(n,),
        in_specs=[
            pl.BlockSpec((1, bb, DATA_COLS), lambda i: (i, 0, 0)),   # per-step data
            pl.BlockSpec((W_ROWS, 128), lambda i: (0, 0)),           # weight slab (loop-invariant)
            pl.BlockSpec((8, 128), lambda i: (0, 0)),                # bias slab  (loop-invariant)
        ],
        out_specs=pl.BlockSpec((1, 1), lambda i: (i, 0),
                               memory_space=pltpu.MemorySpace.SMEM),  # scalar -> SMEM
        compiler_params=pltpu.CompilerParams(
            dimension_semantics=("parallel",)),
        cost_estimate=cost,
    )(data, wslab, bslab)
    return out[:, 0]


def darn_forward_multi(xs, params, key):
    """xs: (N, B, C, H, W) probabilities in [0,1].  Runs N independent
    forward passes (one Bernoulli key each) in a single pallas_call with a
    leading 'parallel' grid axis (amortizes per-call overhead; uses both
    TensorCores on v7x).  Returns (N,) losses."""
    wslab, bslab = params
    n, bb = xs.shape[0], xs.shape[1]
    xp = xs.reshape(n, bb, -1).astype(jnp.float32)                 # (N, B, I)
    u = jax.random.uniform(key, (n, bb, I + S), jnp.float32)       # Bernoulli uniforms
    data = jnp.concatenate([xp, u], axis=-1)                       # (N, B, 2I+S)
    return _darn_pallas(data, wslab, bslab)


def darn_forward(x, params, key):
    """Single-batch forward, equivalent to DARN.forward(x). Returns scalar loss."""
    return darn_forward_multi(x[None], params, key)[0]


if __name__ == "__main__":
    key = jax.random.PRNGKey(0)
    pk, xk, k_fwd, xk2, k_multi = jax.random.split(key, 5)
    params = init_params(pk)

    # input image probabilities in [0, 1), NCHW like the PyTorch module expects
    x = jax.random.uniform(xk, (B,) + INPUT_SHAPE, jnp.float32)
    loss = darn_forward(x, params, k_fwd)            # module-equivalent forward
    jax.block_until_ready(loss)

    # amortized path: 2 independent (batch, key) forwards in one pallas_call
    xs = jax.random.uniform(xk2, (2, B) + INPUT_SHAPE, jnp.float32)
    losses = darn_forward_multi(xs, params, k_multi)
    jax.block_until_ready(losses)

    print("KERNEL_OK")
</pallas_src>

<mosaic_0001>
module attributes {stable_mosaic.version = 11 : i64} {
  func.func @darn_kernel(%arg0: i32, %arg1: memref<1x8x144xf32, #tpu.memory_space<vmem>>, %arg2: memref<208x128xbf16, #tpu.memory_space<vmem>>, %arg3: memref<8x128xf32, #tpu.memory_space<vmem>>, %arg4: memref<1x1xf32, #tpu.memory_space<smem>>) attributes {dimension_semantics = [#tpu.dimension_semantics<parallel>], iteration_bounds = array<i64: 1>, scalar_prefetch = 0 : i64, scratch_operands = 0 : i64, tpu.core_type = #tpu.core_type<tc>, window_params = [{transform_indices = @transform_0, window_bounds = array<i64: 1, 8, 144>}, {pipeline_mode = #tpu.pipeline_mode<synchronous>, transform_indices = @transform_1, window_bounds = array<i64: 208, 128>}, {pipeline_mode = #tpu.pipeline_mode<synchronous>, transform_indices = @transform_2, window_bounds = array<i64: 8, 128>}, {transform_indices = @transform_3, window_bounds = array<i64: 1, 1>}]} {
    %c0 = arith.constant 0 : index
    %c0_0 = arith.constant 0 : index
    %c0_1 = arith.constant 0 : index
    %0 = vector.load %arg1[%c0, %c0_0, %c0_1] : memref<1x8x144xf32, #tpu.memory_space<vmem>>, vector<1x8x144xf32>
    %1 = vector.shape_cast %0 : vector<1x8x144xf32> to vector<8x144xf32>
    %2 = vector.extract_strided_slice %1 {offsets = [0, 0], sizes = [8, 64], strides = [1, 1]} : vector<8x144xf32> to vector<8x64xf32>
    %3 = vector.extract_strided_slice %1 {offsets = [0, 64], sizes = [8, 64], strides = [1, 1]} : vector<8x144xf32> to vector<8x64xf32>
    %4 = vector.extract_strided_slice %1 {offsets = [0, 128], sizes = [8, 16], strides = [1, 1]} : vector<8x144xf32> to vector<8x16xf32>
    %c0_2 = arith.constant 0 : index
    %c0_3 = arith.constant 0 : index
    %5 = vector.load %arg2[%c0_2, %c0_3] : memref<208x128xbf16, #tpu.memory_space<vmem>>, vector<64x128xbf16>
    %c64 = arith.constant 64 : index
    %c0_4 = arith.constant 0 : index
    %6 = vector.load %arg2[%c64, %c0_4] : memref<208x128xbf16, #tpu.memory_space<vmem>>, vector<32x128xbf16>
    %c96 = arith.constant 96 : index
    %c0_5 = arith.constant 0 : index
    %7 = vector.load %arg2[%c96, %c0_5] : memref<208x128xbf16, #tpu.memory_space<vmem>>, vector<16x128xbf16>
    %c112 = arith.constant 112 : index
    %c0_6 = arith.constant 0 : index
    %8 = vector.load %arg2[%c112, %c0_6] : memref<208x128xbf16, #tpu.memory_space<vmem>>, vector<32x128xbf16>
    %c144 = arith.constant 144 : index
    %c0_7 = arith.constant 0 : index
    %9 = vector.load %arg2[%c144, %c0_7] : memref<208x128xbf16, #tpu.memory_space<vmem>>, vector<64x128xbf16>
    %c0_8 = arith.constant 0 : index
    %c0_9 = arith.constant 0 : index
    %10 = vector.load %arg3[%c0_8, %c0_9] : memref<8x128xf32, #tpu.memory_space<vmem>>, vector<8x128xf32>
    %11 = vector.extract_strided_slice %10 {offsets = [0, 0], sizes = [1, 32], strides = [1, 1]} : vector<8x128xf32> to vector<1x32xf32>
    %12 = vector.extract_strided_slice %10 {offsets = [1, 0], sizes = [1, 32], strides = [1, 1]} : vector<8x128xf32> to vector<1x32xf32>
    %13 = vector.extract_strided_slice %10 {offsets = [2, 0], sizes = [1, 16], strides = [1, 1]} : vector<8x128xf32> to vector<1x16xf32>
    %14 = vector.extract_strided_slice %10 {offsets = [3, 0], sizes = [1, 32], strides = [1, 1]} : vector<8x128xf32> to vector<1x32xf32>
    %15 = vector.extract_strided_slice %10 {offsets = [4, 0], sizes = [1, 16], strides = [1, 1]} : vector<8x128xf32> to vector<1x16xf32>
    %16 = vector.extract_strided_slice %10 {offsets = [5, 0], sizes = [1, 64], strides = [1, 1]} : vector<8x128xf32> to vector<1x64xf32>
    %17 = arith.cmpf olt, %3, %2 : vector<8x64xf32>
    %cst = arith.constant 1.000000e+00 : f32
    %cst_10 = arith.constant 0.000000e+00 : f32
    %18 = vector.broadcast %cst : f32 to vector<8x64xf32>
    %19 = vector.broadcast %cst_10 : f32 to vector<8x64xf32>
    %20 = arith.select %17, %18, %19 : vector<8x64xi1>, vector<8x64xf32>
    %21 = arith.truncf %20 : vector<8x64xf32> to vector<8x64xbf16>
    %cst_11 = arith.constant dense<0.000000e+00> : vector<8x128xf32>
    %22 = tpu.matmul %21, %5, %cst_11 {dimension_numbers = #tpu.dot_dimension_numbers<[1], [0], [0], [1], [0, 0, 1, 1], [], []>} : vector<8x64xbf16>, vector<64x128xbf16>, vector<8x128xf32> -> vector<8x128xf32>
    %23 = vector.extract_strided_slice %22 {offsets = [0, 0], sizes = [8, 32], strides = [1, 1]} : vector<8x128xf32> to vector<8x32xf32>
    %cst_12 = arith.constant dense<0.000000e+00> : vector<32xf32>
    %24 = vector.multi_reduction <add>, %23, %cst_12 [0] : vector<8x32xf32> to vector<32xf32>
    %25 = vector.shape_cast %24 : vector<32xf32> to vector<1x32xf32>
    %cst_13 = arith.constant 8.000000e+00 : f32
    %26 = vector.broadcast %cst_13 : f32 to vector<1x32xf32>
    %27 = arith.divf %25, %26 : vector<1x32xf32>
    %28 = vector.broadcast %27 : vector<1x32xf32> to vector<8x32xf32>
    %29 = arith.subf %23, %28 : vector<8x32xf32>
    %30 = arith.mulf %29, %29 : vector<8x32xf32>
    %cst_14 = arith.constant dense<0.000000e+00> : vector<32xf32>
    %31 = vector.multi_reduction <add>, %30, %cst_14 [0] : vector<8x32xf32> to vector<32xf32>
    %32 = vector.shape_cast %31 : vector<32xf32> to vector<1x32xf32>
    %cst_15 = arith.constant 8.000000e+00 : f32
    %33 = vector.broadcast %cst_15 : f32 to vector<1x32xf32>
    %34 = arith.divf %32, %33 : vector<1x32xf32>
    %cst_16 = arith.constant 9.99999974E-6 : f32
    %35 = vector.broadcast %cst_16 : f32 to vector<1x32xf32>
    %36 = arith.addf %34, %35 : vector<1x32xf32>
    %37 = math.rsqrt %36 : vector<1x32xf32>
    %38 = vector.broadcast %37 : vector<1x32xf32> to vector<8x32xf32>
    %39 = arith.mulf %29, %38 : vector<8x32xf32>
    %40 = vector.broadcast %11 : vector<1x32xf32> to vector<8x32xf32>
    %41 = arith.mulf %39, %40 : vector<8x32xf32>
    %42 = vector.broadcast %12 : vector<1x32xf32> to vector<8x32xf32>
    %43 = arith.addf %41, %42 : vector<8x32xf32>
    %cst_17 = arith.constant 0.000000e+00 : f32
    %44 = vector.broadcast %cst_17 : f32 to vector<8x32xf32>
    %45 = arith.maximumf %43, %44 : vector<8x32xf32>
    %46 = arith.truncf %45 : vector<8x32xf32> to vector<8x32xbf16>
    %cst_18 = arith.constant dense<0.000000e+00> : vector<8x128xf32>
    %47 = tpu.matmul %46, %6, %cst_18 {dimension_numbers = #tpu.dot_dimension_numbers<[1], [0], [0], [1], [0, 0, 1, 1], [], []>} : vector<8x32xbf16>, vector<32x128xbf16>, vector<8x128xf32> -> vector<8x128xf32>
    %48 = vector.extract_strided_slice %47 {offsets = [0, 0], sizes = [8, 16], strides = [1, 1]} : vector<8x128xf32> to vector<8x16xf32>
    %49 = vector.broadcast %13 : vector<1x16xf32> to vector<8x16xf32>
    %50 = arith.addf %48, %49 : vector<8x16xf32>
    %51 = arith.negf %50 : vector<8x16xf32>
    %52 = math.exp %51 : vector<8x16xf32>
    %cst_19 = arith.constant 1.000000e+00 : f32
    %53 = vector.broadcast %cst_19 : f32 to vector<8x16xf32>
    %54 = arith.addf %53, %52 : vector<8x16xf32>
    %55 = arith.divf %53, %54 : vector<8x16xf32>
    %56 = arith.cmpf olt, %4, %55 : vector<8x16xf32>
    %cst_20 = arith.constant 1.000000e+00 : f32
    %cst_21 = arith.constant 0.000000e+00 : f32
    %57 = vector.broadcast %cst_20 : f32 to vector<8x16xf32>
    %58 = vector.broadcast %cst_21 : f32 to vector<8x16xf32>
    %59 = arith.select %56, %57, %58 : vector<8x16xi1>, vector<8x16xf32>
    %60 = arith.truncf %59 : vector<8x16xf32> to vector<8x16xbf16>
    %cst_22 = arith.constant dense<0.000000e+00> : vector<8x128xf32>
    %61 = tpu.matmul %60, %7, %cst_22 {dimension_numbers = #tpu.dot_dimension_numbers<[1], [0], [0], [1], [0, 0, 1, 1], [], []>} : vector<8x16xbf16>, vector<16x128xbf16>, vector<8x128xf32> -> vector<8x128xf32>
    %62 = vector.extract_strided_slice %61 {offsets = [0, 0], sizes = [8, 16], strides = [1, 1]} : vector<8x128xf32> to vector<8x16xf32>
    %63 = vector.broadcast %15 : vector<1x16xf32> to vector<8x16xf32>
    %64 = arith.addf %62, %63 : vector<8x16xf32>
    %65 = vector.extract_strided_slice %61 {offsets = [0, 16], sizes = [8, 32], strides = [1, 1]} : vector<8x128xf32> to vector<8x32xf32>
    %66 = vector.broadcast %14 : vector<1x32xf32> to vector<8x32xf32>
    %67 = arith.addf %65, %66 : vector<8x32xf32>
    %cst_23 = arith.constant 0.000000e+00 : f32
    %68 = vector.broadcast %cst_23 : f32 to vector<8x32xf32>
    %69 = arith.maximumf %67, %68 : vector<8x32xf32>
    %70 = arith.truncf %69 : vector<8x32xf32> to vector<8x32xbf16>
    %cst_24 = arith.constant dense<0.000000e+00> : vector<8x128xf32>
    %71 = tpu.matmul %70, %8, %cst_24 {dimension_numbers = #tpu.dot_dimension_numbers<[1], [0], [0], [1], [0, 0, 1, 1], [], []>} : vector<8x32xbf16>, vector<32x128xbf16>, vector<8x128xf32> -> vector<8x128xf32>
    %cst_25 = arith.constant dense<0.000000e+00> : vector<8x128xf32>
    %72 = tpu.matmul %21, %9, %cst_25 {dimension_numbers = #tpu.dot_dimension_numbers<[1], [0], [0], [1], [0, 0, 1, 1], [], []>} : vector<8x64xbf16>, vector<64x128xbf16>, vector<8x128xf32> -> vector<8x128xf32>
    %73 = arith.addf %71, %72 : vector<8x128xf32>
    %74 = vector.extract_strided_slice %73 {offsets = [0, 0], sizes = [8, 64], strides = [1, 1]} : vector<8x128xf32> to vector<8x64xf32>
    %75 = vector.broadcast %16 : vector<1x64xf32> to vector<8x64xf32>
    %76 = arith.addf %74, %75 : vector<8x64xf32>
    %cst_26 = arith.constant 0.000000e+00 : f32
    %77 = vector.broadcast %cst_26 : f32 to vector<8x16xf32>
    %78 = arith.maximumf %50, %77 : vector<8x16xf32>
    %79 = arith.mulf %50, %59 : vector<8x16xf32>
    %80 = arith.subf %78, %79 : vector<8x16xf32>
    %81 = math.absf %50 : vector<8x16xf32>
    %cst_27 = arith.constant 0.000000e+00 : f32
    %82 = vector.broadcast %cst_27 : f32 to vector<8x16xf32>
    %83 = arith.subf %82, %81 : vector<8x16xf32>
    %84 = math.exp %83 : vector<8x16xf32>
    %85 = math.log1p %84 : vector<8x16xf32>
    %86 = arith.addf %80, %85 : vector<8x16xf32>
    %cst_28 = arith.constant 0.000000e+00 : f32
    %87 = vector.broadcast %cst_28 : f32 to vector<8x16xf32>
    %88 = arith.maximumf %64, %87 : vector<8x16xf32>
    %89 = arith.mulf %64, %59 : vector<8x16xf32>
    %90 = arith.subf %88, %89 : vector<8x16xf32>
    %91 = math.absf %64 : vector<8x16xf32>
    %cst_29 = arith.constant 0.000000e+00 : f32
    %92 = vector.broadcast %cst_29 : f32 to vector<8x16xf32>
    %93 = arith.subf %92, %91 : vector<8x16xf32>
    %94 = math.exp %93 : vector<8x16xf32>
    %95 = math.log1p %94 : vector<8x16xf32>
    %96 = arith.addf %90, %95 : vector<8x16xf32>
    %cst_30 = arith.constant 0.000000e+00 : f32
    %97 = vector.broadcast %cst_30 : f32 to vector<8x64xf32>
    %98 = arith.maximumf %76, %97 : vector<8x64xf32>
    %99 = arith.mulf %76, %20 : vector<8x64xf32>
    %100 = arith.subf %98, %99 : vector<8x64xf32>
    %101 = math.absf %76 : vector<8x64xf32>
    %cst_31 = arith.constant 0.000000e+00 : f32
    %102 = vector.broadcast %cst_31 : f32 to vector<8x64xf32>
    %103 = arith.subf %102, %101 : vector<8x64xf32>
    %104 = math.exp %103 : vector<8x64xf32>
    %105 = math.log1p %104 : vector<8x64xf32>
    %106 = arith.addf %100, %105 : vector<8x64xf32>
    %107 = arith.subf %96, %86 : vector<8x16xf32>
    %108 = vector.shape_cast %107 : vector<8x16xf32> to vector<1x8x16xf32>
    %cst_32 = arith.constant dense<0.000000e+00> : vector<1xf32>
    %109 = vector.multi_reduction <add>, %108, %cst_32 [1, 2] : vector<1x8x16xf32> to vector<1xf32>
    %110 = vector.shape_cast %109 : vector<1xf32> to vector<1x1x1xf32>
    %111 = vector.extract %110[0, 0, 0] : f32 from vector<1x1x1xf32>
    %cst_33 = arith.constant 7.812500e-03 : f32
    %112 = arith.mulf %111, %cst_33 : f32
    %113 = vector.shape_cast %106 : vector<8x64xf32> to vector<1x8x64xf32>
    %cst_34 = arith.constant dense<0.000000e+00> : vector<1xf32>
    %114 = vector.multi_reduction <add>, %113, %cst_34 [1, 2] : vector<1x8x64xf32> to vector<1xf32>
    %115 = vector.shape_cast %114 : vector<1xf32> to vector<1x1x1xf32>
    %116 = vector.extract %115[0, 0, 0] : f32 from vector<1x1x1xf32>
    %cst_35 = arith.constant 0.001953125 : f32
    %117 = arith.mulf %116, %cst_35 : f32
    %118 = arith.addf %112, %117 : f32
    %c0_36 = arith.constant 0 : index
    %c0_37 = arith.constant 0 : index
    %119 = memref.load %arg4[%c0_36, %c0_37] : memref<1x1xf32, #tpu.memory_space<smem>>
    memref.store %118, %arg4[%c0_36, %c0_37] : memref<1x1xf32, #tpu.memory_space<smem>>
    return
  }
  func.func @transform_0(%arg0: i32) -> (i32, i32, i32) {
    %c0_i32 = arith.constant 0 : i32
    %c0_i32_0 = arith.constant 0 : i32
    %c0_i32_1 = arith.constant 0 : i32
    return %arg0, %c0_i32, %c0_i32_0 : i32, i32, i32
  }
  func.func @transform_1(%arg0: i32) -> (i32, i32) {
    %c0_i32 = arith.constant 0 : i32
    %c0_i32_0 = arith.constant 0 : i32
    %c0_i32_1 = arith.constant 0 : i32
    return %c0_i32, %c0_i32_0 : i32, i32
  }
  func.func @transform_2(%arg0: i32) -> (i32, i32) {
    %c0_i32 = arith.constant 0 : i32
    %c0_i32_0 = arith.constant 0 : i32
    %c0_i32_1 = arith.constant 0 : i32
    return %c0_i32, %c0_i32_0 : i32, i32
  }
  func.func @transform_3(%arg0: i32) -> (i32, i32) {
    %c0_i32 = arith.constant 0 : i32
    %c0_i32_0 = arith.constant 0 : i32
    return %arg0, %c0_i32 : i32, i32
  }
}

</mosaic_0001>

<bundles_post_ra>
// kernel: tpu_custom_call.1
= control target key start
LH: loop header
LB: loop body
LE: loop exit
PB: predicated region body
PF: predicated region fallthrough
CT: control target
= control target key end

     0   :  { %8 = vsyncpa [#allocation3], 0  ;;  %s905_s0 = inlined_call_operand.hbm [shape: f32[1,8,144], index: 0, kind: input, shape index: {}]   ;;  %s906_s1 = inlined_call_operand.hbm [shape: bf16[208,128], index: 1, kind: input, shape index: {}]   ;;  %s907_s2 = inlined_call_operand.hbm [shape: f32[8,128], index: 2, kind: input, shape index: {}]   ;;  %s908_s3 = inlined_call_operand.hbm [shape: f32[1,1], index: 3, kind: output, shape index: {}]  }
   0x1   :  { %9 = vsyncpa [#allocation6], 0 }
   0x2   :  { %10 = vsyncpa [#allocation4], 0  ;;  %s763_s12 = smov [#allocation5]   ;;  %s681_s16 = scalar_lea.hbm %s906_s1, 1664 }
   0x3   :  { %s26_s13 = sshll.u32 %s763_s12, 4  ;;  %p682_p0 = scmp.ne.s32.totalorder %s906_s1, %s681_s16  ;;  %s27_s13 = int_to_ptr.vmem [resolvable:$true] %s26_s13 }
   0x4   :  { %p685_p1 = scmp.lt.u32.totalorder %s681_s16, %s906_s1 }
   0x6   :  { %p687_p2 = pnand %p685_p1, %p682_p0 }
   0x8   :  { %690 = shalt.err (!%p687_p2)
}
   0x9   :  { %s691_s21 = scalar_lea.vmem %s27_s13, 1664  ;;  %p696_p4 = scmp.lt.s32.totalorder %s27_s13, %s27_s13 }
   0xa   :  { %p692_p3 = scmp.ne.s32.totalorder %s27_s13, %s691_s21  ;;  %p697_p5 = scmp.lt.s32.totalorder %s691_s21, %s691_s21 }
   0xc   :  { %p698_p6 = por %p697_p5, %p696_p4 }
   0xe   :  { %p699_p7 = pnand %p698_p6, %p692_p3 }
  0x10   :  { %702 = shalt.err (!%p699_p7)
}
  0x11   :  { %s764_s22 = smov 64   ;;  %s765_s23 = smov 4  }
  0x12   :  { %32 = dma.hbm_to_vmem [thread:$0]  %s906_s1, 1664, %s27_s13, [#allocation6], %s764_s22, %s764_s22, %s765_s23  }
  0x13   :  { %s766_s26 = smov [#allocation2]   ;;  %s767_s28 = smov [#allocation7]  }
  0x14   :  { %s17_s27 = sshll.u32 %s766_s26, 4  ;;  %s39_s29 = sshll.u32 %s767_s28, 4  ;;  %s18_s27 = int_to_ptr.vmem [resolvable:$true] %s17_s27  ;;  %s40_s29 = int_to_ptr.vmem [resolvable:$true] %s39_s29 }
  0x15   :  { %s703_s5 = scalar_lea.hbm %s905_s0, 256 }
  0x16   :  { %p704_p8 = scmp.ne.s32.totalorder %s905_s0, %s703_s5  ;;  %p707_p9 = scmp.lt.u32.totalorder %s703_s5, %s905_s0 }
  0x18   :  { %p709_p10 = pnand %p707_p9, %p704_p8 }
  0x1a   :  { %712 = shalt.err (!%p709_p10)
}
  0x1b   :  { %s713_s1 = scalar_lea.vmem %s18_s27, 256  ;;  %p718_p12 = scmp.lt.s32.totalorder %s18_s27, %s18_s27 }
  0x1c   :  { %p714_p11 = scmp.ne.s32.totalorder %s18_s27, %s713_s1  ;;  %p719_p13 = scmp.lt.s32.totalorder %s713_s1, %s713_s1 }
  0x1e   :  { %p720_p0 = por %p719_p13, %p718_p12 }
  0x20   :  { %p721_p1 = pnand %p720_p0, %p714_p11 }
  0x22   :  { %724 = shalt.err (!%p721_p1)
}
  0x23   :  { %20 = dma.hbm_to_vmem [thread:$0]  %s905_s0, 256, %s18_s27, [#allocation3]  }
  0x24   :  { %s725_s14 = scalar_lea.hbm %s907_s2, 128 }
  0x25   :  { %p726_p2 = scmp.ne.s32.totalorder %s907_s2, %s725_s14  ;;  %p729_p3 = scmp.lt.u32.totalorder %s725_s14, %s907_s2 }
  0x27   :  { %p731_p4 = pnand %p729_p3, %p726_p2 }
  0x29   :  { %734 = shalt.err (!%p731_p4)
}
  0x2a   :  { %s735_s19 = scalar_lea.vmem %s40_s29, 128  ;;  %p740_p6 = scmp.lt.s32.totalorder %s40_s29, %s40_s29 }
  0x2b   :  { %p736_p5 = scmp.ne.s32.totalorder %s40_s29, %s735_s19  ;;  %p741_p7 = scmp.lt.s32.totalorder %s735_s19, %s735_s19 }
  0x2d   :  { %p742_p8 = por %p741_p7, %p740_p6 }
  0x2f   :  { %p743_p9 = pnand %p742_p8, %p736_p5 }
  0x31   :  { %746 = shalt.err (!%p743_p9)
}
  0x32   :  { %42 = dma.hbm_to_vmem [thread:$0]  %s907_s2, 128, %s40_s29, [#allocation6]  }
  0x33   :  { %757 = dma.done.wait [#allocation3], 256  }
  0x34   :  { %758 = vsyncadd [#allocation3], 4294967040 }
  0x35   :  { %759 = dma.done.wait [#allocation6], 1792  }
  0x36   :  { %760 = vsyncadd [#allocation6], 4294965504  ;;  %v768_v0 = vmov 0.0   ;;  %vm769_vm0 = vmmov 0   ;;  %v53_v1 = vld [vmem:[#allocation2] sm:$0xff]  ;;  %v650_v2 = vld [vmem:[#allocation5] sm:$0xff]   ;;  %v183_v42 = vlaneseq }
  0x37   :  { %590 = vmatprep.subr.bf16.mxu0 %v768_v0  ;;  %602 = vmatprep.subr.bf16.mxu1 %v768_v0  ;;  %v651_v3 = vld [vmem:[#allocation5 + $0x8] sm:$0xff]   ;;  %v652_v4 = vld [vmem:[#allocation5 + $0x10] sm:$0xff]   ;;  %v653_v5 = vld [vmem:[#allocation5 + $0x18] sm:$0xff]   ;;  %vm116_vm2 = vcmask 523264   ;;  %vm160_vm3 = vcmask 261120   ;;  %s770_s2 = smov 16  }
  0x38   :  { %598 = vmatprep.mubr.msk.bf16.mxu0 %vm769_vm0, %v768_v0  ;;  %606 = vmatprep.mubr.msk.bf16.mxu1 %vm769_vm0, %v768_v0  ;;  %v654_v9 = vld [vmem:[#allocation5 + $0x48] sm:$0xff]   ;;  %v655_v11 = vld [vmem:[#allocation5 + $0x50] sm:$0xff]   ;;  %v656_v12 = vld [vmem:[#allocation5 + $0x58] sm:$0xff]   ;;  %v858_v44 = vshrl.u32 %v183_v42, 7  ;;  %vm270_vm5 = vcmask 130048   ;;  %s771_s21 = smov 112  }
  0x39   :  { %83 = vrot.lane.b32.xlu0 %v53_v1, %s764_s22  ;;  %591 = vmatpush3.bf16.msra.mxu0 %v650_v2  ;;  %v657_v13 = vld [vmem:[#allocation5 + $0x60] sm:$0xff]   ;;  %v659_v15 = vld [vmem:[#allocation5 + $0x28] sm:$0xff]   ;;  %v660_v56 = vld [vmem:[#allocation5 + $0x30] sm:$0xff]   ;;  %s747_s29 = scalar_lea.hbm %s908_s3, 16 }
  0x3a   :  { %592 = vmatprep.subr.bf16.mxu0 %v768_v0  ;;  %v658_v14 = vld [vmem:[#allocation5 + $0x20] sm:$0xff]   ;;  %v185_v45 = vsub.s32 0, %v858_v44  ;;  %v861_v46 = vld [vmem:[#allocation7] sm:$0xff]  ;;  %v190_v47 = vsub.s32 1, %v858_v44  ;;  %v321_v57 = vsub.s32 3, %v858_v44  ;;  %v252_v59 = vsub.s32 2, %v858_v44  ;;  %p748_p10 = scmp.ne.s32.totalorder %s908_s3, %s747_s29  ;;  %p751_p11 = scmp.lt.u32.totalorder %s747_s29, %s908_s3 }
  0x3b   :  { %603 = vmatpush3.bf16.msra.mxu1 %v658_v14  ;;  %v316_v14 = vsub.s32 4, %v858_v44 }
  0x3c   :  { %604 = vmatprep.subr.bf16.mxu1 %v768_v0  ;;  %v186_v48 = vrot.slane %v861_v46, %v185_v45  ;;  %v191_v51 = vrot.slane %v861_v46, %v190_v47  ;;  %v322_v58 = vrot.slane %v861_v46, %v321_v57  ;;  %v253_v60 = vrot.slane %v861_v46, %v252_v59  ;;  %p753_p12 = pnand %p751_p11, %p748_p10 }
  0x3d   :  { %593 = vmatpush3.bf16.msra.mxu0 %v651_v3 }
  0x3e   :  { %594 = vmatprep.subr.bf16.mxu0 %v768_v0  ;;  %324 = vrot.lane.b32.xlu1 %v322_v58, %s770_s2 }
  0x3f   :  { %605 = vmatpush3.bf16.msra.mxu1 %v659_v15 }
  0x40   :  { %610 = vmatprep.subr.bf16.mxu1 %v768_v0 }
  0x41   :  { %595 = vmatpush3.bf16.msra.mxu0 %v652_v4 }
  0x42   :  { %596 = vmatprep.subr.bf16.mxu0 %v768_v0 }
  0x45   :  { %597 = vmatpush3.bf16.msra.mxu0 %v653_v5 }
  0x46   :  { %616 = vmatprep.subr.bf16.mxu0 %v768_v0 }
  0xab   :  { %v84_v6 = vpop.permute.xlu0 %83 }
  0xac   :  { %vm86_vm1 = vcmp.lt.f32.partialorder %v53_v1, %v84_v6  ;;  %v54_v6 = vld [vmem:[#allocation2 + $0x8] sm:$0xff] }
  0xad   :  { %v87_v7 = vsel %vm86_vm1, 1.0, %v768_v0 }
  0xae   :  { %v88_v8 = vpack.c.bf16 %v87_v7, %v87_v7 }
  0xb0   :  { %90 = vrot.lane.b32.xlu0 %v88_v8, %s764_s22 }
  0xb4   :  { %493 = vrot.lane.b32.xlu0 %v87_v7, %s764_s22 }
 0x122   :  { %v91_v10 = vpop.permute.xlu0 %90 }
 0x123   :  { %599 = vmatmul.mubr.msk.bf16.vlgmr.msra.gmra.mrb[0].mxu0 %vm116_vm2, %v91_v10 }
 0x124   :  { %617 = vmatpush3.bf16.msra.mxu0 %v654_v9  ;;  %624 = vmatprep.mubr.msk.bf16.mxu0 %vm769_vm0, %v768_v0 }
 0x125   :  { %618 = vmatprep.subr.bf16.mxu0 %v768_v0 }
 0x128   :  { %619 = vmatpush3.bf16.msra.mxu0 %v655_v11  ;;  %v662_v11 = vld [vmem:[#allocation5 + $0x40] sm:$0xff]  }
 0x129   :  { %620 = vmatprep.subr.bf16.mxu0 %v768_v0 }
 0x12c   :  { %621 = vmatpush3.bf16.msra.mxu0 %v656_v12 }
 0x12d   :  { %622 = vmatprep.subr.bf16.mxu0 %v768_v0 }
 0x130   :  { %623 = vmatpush3.bf16.msra.mxu0 %v657_v13 }
 0x133   :  { %625 = vmatmul.mubr.msk.bf16.vlgmr.msra.gmra.mrb[4].mxu0 %vm116_vm2, %v91_v10  ;;  %v661_v10 = vld [vmem:[#allocation5 + $0x38] sm:$0xff]  }
 0x1f6   :  { %v154_v16 = vpop.f32.mrb[0].mxu0 }
 0x1f7   :  { %v161_v17 = vsel %vm160_vm3, %v154_v16, 0.0  ;;  %v600_v18 = vpop.f32.mrb[1].mxu0 }
 0x1f8   :  { %v162_v19 = vrot.slane %v161_v17, 4  ;;  %v157_v20 = vpop.f32.mrb[2].mxu0 }
 0x1f9   :  { %v601_v21 = vpop.f32.mrb[3].mxu0 }
 0x1fa   :  { %v163_v22 = vadd.f32 %v162_v19, %v161_v17  ;;  %v325_v17 = vpop.permute.xlu1 %324 }
 0x1fc   :  { %v164_v23 = vrot.slane %v163_v22, 2 }
 0x1fe   :  { %v165_v24 = vadd.f32 %v164_v23, %v163_v22 }
 0x200   :  { %v166_v25 = vrot.slane %v165_v24, 1 }
 0x202   :  { %v167_v26 = vadd.f32 %v166_v25, %v165_v24 }
 0x204   :  { %v169_v27 = vmul.f32 0.125, %v167_v26 }
 0x206   :  { %v170_v28 = vsub.f32 %v154_v16, %v169_v27  ;;  %v855_v29 = vpop.f32.mrb[4].mxu0  ;;  %v317_v16 = vrot.slane %v861_v46, %v316_v14 }
 0x207   :  { %v626_v30 = vpop.f32.mrb[5].mxu0 }
 0x208   :  { %v171_v31 = vmul.f32 %v170_v28, %v170_v28  ;;  %v391_v32 = vpop.f32.mrb[6].mxu0 }
 0x209   :  { %v627_v33 = vpop.f32.mrb[7].mxu0 }
 0x20a   :  { %v172_v34 = vsel %vm160_vm3, %v171_v31, 0.0 }
 0x20b   :  { %v173_v35 = vrot.slane %v172_v34, 4 }
 0x20d   :  { %v174_v36 = vadd.f32 %v173_v35, %v172_v34 }
 0x20f   :  { %v175_v37 = vrot.slane %v174_v36, 2 }
 0x211   :  { %v176_v38 = vadd.f32 %v175_v37, %v174_v36 }
 0x213   :  { %v177_v39 = vrot.slane %v176_v38, 1 }
 0x215   :  { %v178_v40 = vadd.f32 %v177_v39, %v176_v38 }
 0x217   :  { %v179_v41 = vmul.f32 0.125, %v178_v40 }
 0x219   :  { %v180_v43 = vadd.f32 1e-05, %v179_v41 }
 0x21b   :  { %663 = vrsqrt.f32 %v180_v43 }
 0x225   :  { %v664_v49 = vpop.eup %663 }
 0x226   :  { %v182_v50 = vmul.f32 %v664_v49, %v170_v28 }
 0x228   :  { %v187_v52 = vmul.f32 %v186_v48, %v182_v50 }
 0x22a   :  { %v192_v53 = vadd.f32 %v191_v51, %v187_v52 }
 0x22c   :  { %v193_v54 = vmax.f32 %v192_v53, 0.0 }
 0x22e   :  { %v194_v55 = vpack.c.bf16 %v193_v54, %v193_v54 }
 0x230   :  { %607 = vmatmul.mubr.msk.bf16.vlgmr.msra.gmra.mrb[0].mxu1 %vm160_vm3, %v194_v55 }
 0x231   :  { %612 = vmatprep.mubr.msk.bf16.mxu1 %vm769_vm0, %v768_v0  ;;  %611 = vmatpush3.bf16.msra.mxu1 %v660_v56 }
 0x232   :  { %628 = vmatprep.subr.bf16.mxu1 %v768_v0 }
 0x303   :  { %v244_v61 = vpop.f32.mrb[0].mxu1 }
 0x304   :  { %v874_v62 = vadd.f32 %v253_v60, %v244_v61  ;;  %v608_v63 = vpop.f32.mrb[1].mxu1 }
 0x305   :  { %v247_v1 = vpop.f32.mrb[2].mxu1 }
 0x306   :  { %v561_v2 = vmul.f32 -1.442695, %v874_v62  ;;  %v609_v3 = vpop.f32.mrb[3].mxu1  ;;  %v460_v12 = vand.u32 2147483647, %v874_v62  ;;  %v457_v43 = vmax.f32 %v874_v62, 0.0 }
 0x308   :  { %665 = vpow2.f32 %v561_v2  ;;  %v461_v13 = vsub.f32 0.0, %v460_v12 }
 0x30a   :  { %v462_v15 = vmul.f32 1.442695, %v461_v13 }
 0x312   :  { %v666_v4 = vpop.eup %665 }
 0x313   :  { %v258_v5 = vadd.f32 1.0, %v666_v4  ;;  %v454_v4 = vsub.s32 5, %v858_v44 }
 0x315   :  { %667 = vrcp.f32 %v258_v5  ;;  %v455_v5 = vrot.slane %v861_v46, %v454_v4 }
 0x316   :  { %669 = vpow2.f32 %v462_v15 }
 0x31f   :  { %v668_v7 = vpop.eup %667 }
 0x320   :  { %vm261_vm4 = vcmp.lt.f32.partialorder %v54_v6, %v668_v7  ;;  %v670_v28 = vpop.eup %669 }
 0x321   :  { %v262_v8 = vsel %vm261_vm4, 1.0, %v768_v0  ;;  %v464_v30 = vadd.f32 1.0, %v670_v28  ;;  %v467_v33 = vmul.f32 -0.5, %v670_v28  ;;  %v470_v38 = vand.u32 2147483647, %v670_v28 }
 0x322   :  { %v263_v9 = vpack.c.bf16 %v262_v8, %v262_v8  ;;  %v458_v37 = vmul.f32 %v262_v8, %v874_v62 }
 0x323   :  { %v468_v36 = vadd.f32 1.0, %v467_v33  ;;  %vm471_vm6 = vcmp.lt.f32.partialorder %v470_v38, 0.0004427343 }
 0x324   :  { %613 = vmatmul.mubr.msk.bf16.vlgmr.msra.gmra.mrb[4].mxu1 %vm270_vm5, %v263_v9  ;;  %v459_v49 = vsub.f32 %v457_v43, %v458_v37 }
 0x325   :  { %632 = vmatprep.mubr.msk.bf16.mxu1 %vm769_vm0, %v768_v0  ;;  %629 = vmatpush3.bf16.msra.mxu1 %v661_v10  ;;  %v469_v47 = vmul.f32 %v670_v28, %v468_v36 }
 0x326   :  { %630 = vmatprep.subr.bf16.mxu1 %v768_v0 }
 0x329   :  { %631 = vmatpush3.bf16.msra.mxu1 %v662_v11 }
 0x3f7   :  { %v308_v18 = vpop.f32.mrb[4].mxu1 }
 0x3f8   :  { %v318_v19 = vadd.f32 %v317_v16, %v308_v18  ;;  %v327_v20 = vadd.f32 %v325_v17, %v308_v18  ;;  %v614_v21 = vpop.f32.mrb[5].mxu1  ;;  %v494_v18 = vpop.permute.xlu0 %493 }
 0x3f9   :  { %v311_v22 = vpop.f32.mrb[6].mxu1 }
 0x3fa   :  { %v328_v23 = vmax.f32 %v327_v20, 0.0  ;;  %v477_v24 = vand.u32 2147483647, %v318_v19  ;;  %v615_v25 = vpop.f32.mrb[7].mxu1  ;;  %v474_v41 = vmax.f32 %v318_v19, 0.0  ;;  %v475_v42 = vmul.f32 %v318_v19, %v262_v8 }
 0x3fc   :  { %v329_v0 = vpack.c.bf16 %v328_v23, %v328_v23  ;;  %v478_v26 = vsub.f32 0.0, %v477_v24  ;;  %v476_v53 = vsub.f32 %v474_v41, %v475_v42 }
 0x3fe   :  { %v479_v27 = vmul.f32 1.442695, %v478_v26  ;;  %395 = vrot.lane.b32.xlu1 %v329_v0, %s771_s21 }
 0x400   :  { %671 = vpow2.f32 %v479_v27 }
 0x401   :  { %673 = vlog2.f32 %v464_v30 }
 0x40a   :  { %v672_v31 = vpop.eup %671 }
 0x40b   :  { %v481_v32 = vadd.f32 1.0, %v672_v31  ;;  %v484_v34 = vmul.f32 -0.5, %v672_v31  ;;  %v674_v35 = vpop.eup %673  ;;  %v487_v45 = vand.u32 2147483647, %v672_v31 }
 0x40c   :  { %v466_v39 = vmul.f32 0.6931472, %v674_v35 }
 0x40d   :  { %675 = vlog2.f32 %v481_v32  ;;  %v485_v40 = vadd.f32 1.0, %v484_v34  ;;  %vm488_vm7 = vcmp.lt.f32.partialorder %v487_v45, 0.0004427343 }
 0x40e   :  { %v472_v50 = vsel %vm471_vm6, %v469_v47, %v466_v39 }
 0x40f   :  { %v486_v52 = vmul.f32 %v672_v31, %v485_v40  ;;  %v473_v55 = vadd.f32 %v472_v50, %v459_v49 }
 0x417   :  { %v676_v48 = vpop.eup %675 }
 0x418   :  { %v483_v51 = vmul.f32 0.6931472, %v676_v48 }
 0x41a   :  { %v489_v54 = vsel %vm488_vm7, %v486_v52, %v483_v51 }
 0x41b   :  { %v490_v56 = vadd.f32 %v489_v54, %v476_v53 }
 0x41d   :  { %v512_v57 = vsub.f32 %v490_v56, %v473_v55 }
 0x41f   :  { %v513_v58 = vsel %vm270_vm5, %v512_v57, 0.0 }
 0x422   :  { %514 = vadd.xlane.f32.xlu1 %v513_v58 }
 0x470   :  { %v396_v59 = vpop.permute.xlu1 %395 }
 0x471   :  { %633 = vmatmul.mubr.msk.bf16.vlgmr.msra.gmra.mrb[8].mxu1 %vm160_vm3, %v396_v59 }
 0x4af   :  { %v515_v60 = vpop.xlane.xlu1 %514 }
 0x4b0   :  { %v516_v61 = vrot.slane %v515_v60, 4 }
 0x4b2   :  { %v517_v62 = vadd.f32 %v516_v61, %v515_v60 }
 0x4b4   :  { %v518_v63 = vrot.slane %v517_v62, 2 }
 0x4b6   :  { %v519_v1 = vadd.f32 %v518_v63, %v517_v62 }
 0x4b8   :  { %v520_v2 = vrot.slane %v519_v1, 1 }
 0x4ba   :  { %v521_v3 = vadd.f32 %v520_v2, %v519_v1 }
 0x4bc   :  { %636 = vpush %v521_v3 }
 0x4ed   :  { %s637_s22 = spop %636 }
 0x4ee   :  { %s523_s23 = smul.f32 0.0078125, %s637_s22 }
 0x544   :  { %v446_v6 = vpop.f32.mrb[8].mxu1 }
 0x545   :  { %v447_v7 = vadd.f32 %v446_v6, %v855_v29  ;;  %v634_v8 = vpop.f32.mrb[9].mxu1 }
 0x546   :  { %v449_v9 = vpop.f32.mrb[10].mxu1 }
 0x547   :  { %v456_v10 = vadd.f32 %v455_v5, %v447_v7  ;;  %v635_v11 = vpop.f32.mrb[11].mxu1 }
 0x549   :  { %v498_v12 = vand.u32 2147483647, %v456_v10  ;;  %v491_v44 = vmax.f32 %v456_v10, 0.0  ;;  %v496_v20 = vmul.f32 %v494_v18, %v456_v10 }
 0x54b   :  { %v499_v13 = vsub.f32 0.0, %v498_v12  ;;  %v497_v23 = vsub.f32 %v491_v44, %v496_v20 }
 0x54d   :  { %v500_v14 = vmul.f32 1.442695, %v499_v13 }
 0x54f   :  { %677 = vpow2.f32 %v500_v14 }
 0x559   :  { %v678_v15 = vpop.eup %677 }
 0x55a   :  { %v502_v16 = vadd.f32 1.0, %v678_v15  ;;  %v505_v17 = vmul.f32 -0.5, %v678_v15  ;;  %v508_v46 = vand.u32 2147483647, %v678_v15 }
 0x55c   :  { %679 = vlog2.f32 %v502_v16  ;;  %v506_v19 = vadd.f32 1.0, %v505_v17  ;;  %vm509_vm8 = vcmp.lt.f32.partialorder %v508_v46, 0.0004427343 }
 0x55e   :  { %v507_v29 = vmul.f32 %v678_v15, %v506_v19 }
 0x566   :  { %v680_v21 = vpop.eup %679 }
 0x567   :  { %v504_v22 = vmul.f32 0.6931472, %v680_v21 }
 0x569   :  { %v510_v24 = vsel %vm509_vm8, %v507_v29, %v504_v22 }
 0x56a   :  { %v511_v25 = vadd.f32 %v510_v24, %v497_v23 }
 0x56c   :  { %v524_v0 = vsel %vm116_vm2, %v511_v25, 0.0 }
 0x56d   :  { %525 = vadd.xlane.f32.xlu0 %v524_v0 }
 0x5fa   :  { %v526_v26 = vpop.xlane.xlu0 %525 }
 0x5fb   :  { %v527_v27 = vrot.slane %v526_v26, 4 }
 0x5fd   :  { %v528_v28 = vadd.f32 %v527_v27, %v526_v26 }
 0x5ff   :  { %v529_v30 = vrot.slane %v528_v28, 2 }
 0x601   :  { %v530_v31 = vadd.f32 %v529_v30, %v528_v28 }
 0x603   :  { %v531_v32 = vrot.slane %v530_v31, 1 }
 0x605   :  { %v532_v33 = vadd.f32 %v531_v32, %v530_v31 }
 0x607   :  { %638 = vpush %v532_v33 }
 0x638   :  { %s639_s24 = spop %638 }
 0x639   :  { %s534_s25 = smul.f32 0.001953125, %s639_s24 }
 0x63b   :  { %s535_s26 = sadd.f32 %s534_s25, %s523_s23 }
 0x63d   :  { %537 = sst [smem:[#allocation8]] %s535_s26 }
 0x63e   :  { %756 = shalt.err (!%p753_p12)
}
 0x63f   :  { %s772_s7 = smov [#allocation8]  }
 0x640   :  { %545 = dma.smem_to_hbm %s772_s7, 16, %s908_s3, [#allocation4]  }
 0x641   :  { %761 = dma.done.wait [#allocation4], 16  }
 0x642   :  { %762 = vsyncadd [#allocation4], 4294967280 }
 0x643   :  { %549 = sfence }
 0x644   :  { %550 = vsyncpa [#allocation3], 1 }
 0x645   :  { %551 = vsyncpa [#allocation6], 1 }
 0x646   :  { %552 = vsyncpa [#allocation4], 1 }

</bundles_post_ra>
